<compile_context>
chip_gen: v6e
topology: v6e:2x2x1
jax: 0.10.0
libtpu: 0.0.40
codegen_flags: <defaults>
</compile_context>

<pallas_src>
import jax
import jax.numpy as jnp
import numpy as np
from jax.experimental import pallas as pl
from jax.experimental.pallas import tpu as pltpu

_BN_EPS = 1e-5


def _mozafari_head_kernel(x_ref, wbig_ref, b3_ref, out_ref):
    """Conv2d(3,H,pad=1) + BN + ReLU + MaxPool2d(3,1) for a (TB, L, C*H) tile.

    x_ref   : (TB, L, C*H)  stacked hidden states, columns laid out c*H + h
    wbig_ref: (C*H, 9*C)    fused conv taps, columns laid out kh*3C + j*C + o
    b3_ref  : (1, 1, 3*C)   conv bias + BN shift, columns laid out j*C + o
    out_ref : (TB, L-2, C)  max-pooled activations (sequence row, channel)
    """
    TB, L, K = x_ref.shape
    C3 = b3_ref.shape[-1]          # 3 * C
    C = C3 // 3

    # One lane-dense MXU matmul: all 3 height taps x 3 width positions at once.
    x2 = x_ref[...].reshape(TB * L, K)
    big = jnp.dot(x2, wbig_ref[...], preferred_element_type=jnp.float32)
    big = big.reshape(TB, L, 3 * C3)                                   # (TB, L, 9C)

    # Height tap kh contributes to conv output row i from source row i - 1 + kh;
    # shifts are done on the small matmul result, zero rows implement padding=1.
    t0 = big[:, :, :C3]            # kh = 0  -> +1 row shift
    t1 = big[:, :, C3:2 * C3]      # kh = 1  -> aligned
    t2 = big[:, :, 2 * C3:]        # kh = 2  -> -1 row shift
    zrow = jnp.zeros((TB, 1, C3), jnp.float32)
    conv = (jnp.concatenate([zrow, t0[:, :L - 1, :]], axis=1)
            + t1
            + jnp.concatenate([t2[:, 1:, :], zrow], axis=1))           # (TB, L, 3C)

    # BN scale already folded into wbig; add (bias + BN shift) then ReLU.
    act = jnp.maximum(conv + b3_ref[...], 0.0)                         # (TB, L, 3C)

    # Max over the 3 conv width positions (columns are [j=0 | j=1 | j=2]).
    wmax = jnp.maximum(jnp.maximum(act[:, :, :C], act[:, :, C:2 * C]),
                       act[:, :, 2 * C:])                              # (TB, L, C)

    # MaxPool2d(kernel=3, stride=1): 3-row windows along the sequence axis.
    pooled = jnp.maximum(jnp.maximum(wmax[:, :L - 2, :], wmax[:, 1:L - 1, :]),
                         wmax[:, 2:, :])                               # (TB, L-2, C)
    out_ref[...] = pooled.astype(out_ref.dtype)


def _pick_batch_tile(batch, tile_cap=8):
    """Largest divisor of `batch` <= tile_cap that keeps >= 2 grid steps
    (so v7x's two TensorCores both get work via the parallel batch axis)."""
    best = 1
    for tb in range(1, min(batch, tile_cap) + 1):
        if batch % tb == 0 and (batch // tb >= 2 or batch == 1):
            best = tb
    return best


def mozafari_head(hidden_states, conv_w, conv_b, bn_gamma, bn_beta, bn_mean,
                  bn_var, fc_w, fc_b, *, compute_dtype=jnp.float32, tile_cap=8):
    """Forward pass of BertClassificationMozafariHeader.

    hidden_states: list of (B, L, H) arrays (embedding output + C layer outputs);
                   element [0] is dropped, matching the PyTorch module.
    conv_w: (C, C, 3, H), conv_b: (C,), bn_*: (C,),
    fc_w: (NC, C*(L-2)), fc_b: (NC,).   Returns (B, NC) float32 logits.
    """
    # Stack the layers channels-last: (B, L, C, H) -> (B, L, C*H).  This is the
    # only materialization of the large activation (no pad / transpose pass).
    x = jnp.stack(hidden_states[1:], axis=2)
    B, L, C, H = x.shape
    NC = fc_w.shape[0]
    x2 = x.reshape(B, L, C * H).astype(compute_dtype)

    # Fold inference BatchNorm into the conv:  bn(conv+b) = scale*conv + shift.
    scale = bn_gamma / jnp.sqrt(bn_var + _BN_EPS)                      # (C,)
    ws = conv_w * scale[:, None, None, None]                           # (O, I, 3, H)

    # Width padding=1 folded into per-output-position weights (j = 0, 1, 2).
    z = jnp.zeros_like(ws[..., :1])
    w_j0 = jnp.concatenate([ws[..., 1:], z], axis=-1)                  # left pad col
    w_j1 = ws                                                          # centre col
    w_j2 = jnp.concatenate([z, ws[..., :-1]], axis=-1)                 # right pad col
    wj = jnp.stack([w_j0, w_j1, w_j2], axis=0)                         # (j, o, c, kh, h)
    # rows (c, h); cols (kh, j, o)  ->  one lane-dense (C*H, 9C) matmul weight.
    wbig = jnp.transpose(wj, (2, 4, 3, 0, 1)).reshape(C * H, 9 * C)
    wbig = wbig.astype(compute_dtype)

    shift = scale * (conv_b - bn_mean) + bn_beta                       # (C,)
    b3 = jnp.tile(shift, 3).reshape(1, 1, 3 * C).astype(jnp.float32)   # (j, o) layout

    tb = _pick_batch_tile(B, tile_cap)
    pooled = pl.pallas_call(
        _mozafari_head_kernel,
        out_shape=jax.ShapeDtypeStruct((B, L - 2, C), jnp.float32),
        grid_spec=pltpu.PrefetchScalarGridSpec(
            num_scalar_prefetch=0,
            grid=(B // tb,),
            in_specs=[
                pl.BlockSpec((tb, L, C * H), lambda b: (b, 0, 0)),
                pl.BlockSpec((C * H, 9 * C), lambda b: (0, 0)),
                pl.BlockSpec((1, 1, 3 * C), lambda b: (0, 0, 0)),
            ],
            out_specs=pl.BlockSpec((tb, L - 2, C), lambda b: (b, 0, 0)),
        ),
        compiler_params=pltpu.CompilerParams(
            dimension_semantics=("parallel",),
            vmem_limit_bytes=32 * 1024 * 1024),
    )(x2, wbig, b3)

    # Flatten + Linear (tiny) in plain JAX; the fc weight is re-ordered so the
    # kernel's (row, channel) pooled layout flattens row-major (matches the
    # PyTorch c-major flatten of (B, C, L-2, 1)).
    fc_w_r = jnp.transpose(fc_w.reshape(NC, C, L - 2), (0, 2, 1)).reshape(
        NC, (L - 2) * C).T                                             # ((L-2)*C, NC)
    return pooled.reshape(B, (L - 2) * C) @ fc_w_r + fc_b


def reference(hidden_states, conv_w, conv_b, bn_gamma, bn_beta, bn_mean,
              bn_var, fc_w, fc_b):
    """Pure-JAX reference mirroring the PyTorch module (inference-mode BN)."""
    x = jnp.stack(hidden_states[1:], axis=1)                           # (B, C, L, H)
    dn = jax.lax.conv_dimension_numbers(x.shape, conv_w.shape,
                                        ('NCHW', 'OIHW', 'NCHW'))
    y = jax.lax.conv_general_dilated(x, conv_w, window_strides=(1, 1),
                                     padding=[(1, 1), (1, 1)],
                                     dimension_numbers=dn)
    y = y + conv_b[None, :, None, None]                                # (B, C, L, 3)
    y = (y - bn_mean[None, :, None, None]) / jnp.sqrt(
        bn_var[None, :, None, None] + _BN_EPS)
    y = y * bn_gamma[None, :, None, None] + bn_beta[None, :, None, None]
    y = jnp.maximum(y, 0.0)
    p = jax.lax.reduce_window(y, -jnp.inf, jax.lax.max,
                              window_dimensions=(1, 1, 3, 3),
                              window_strides=(1, 1, 1, 1),
                              padding='VALID')                         # (B, C, L-2, 1)
    return p.reshape(p.shape[0], -1) @ fc_w.T + fc_b


if __name__ == "__main__":
    # batch, max_length, hidden_size, hidden_layer_num, num_classes
    B, L, H, C, NC = 4, 8, 32, 4, 4

    key = jax.random.PRNGKey(0)
    keys = jax.random.split(key, 13)

    # hidden_states: (C + 1) tensors of (B, L, H); [0] is the embedding output.
    hidden_states = [jax.random.normal(keys[i], (B, L, H), jnp.float32)
                     for i in range(C + 1)]

    # Conv2d(C, C, kernel=(3, H), padding=1) params (PyTorch-style uniform init).
    bnd = 1.0 / (C * 3 * H) ** 0.5
    conv_w = jax.random.uniform(keys[5], (C, C, 3, H), jnp.float32, -bnd, bnd)
    conv_b = jax.random.uniform(keys[6], (C,), jnp.float32, -bnd, bnd)

    # BatchNorm2d(C) inference parameters.
    bn_gamma = jax.random.uniform(keys[7], (C,), jnp.float32, 0.5, 1.5)
    bn_beta = 0.1 * jax.random.normal(keys[8], (C,), jnp.float32)
    bn_mean = 0.1 * jax.random.normal(keys[9], (C,), jnp.float32)
    bn_var = jax.random.uniform(keys[10], (C,), jnp.float32, 0.5, 1.5)

    # Linear(C * (L - 2), NC).
    bnd_fc = 1.0 / (C * (L - 2)) ** 0.5
    fc_w = jax.random.uniform(keys[11], (NC, C * (L - 2)), jnp.float32,
                              -bnd_fc, bnd_fc)
    fc_b = jax.random.uniform(keys[12], (NC,), jnp.float32, -bnd_fc, bnd_fc)

    out = mozafari_head(hidden_states, conv_w, conv_b, bn_gamma, bn_beta,
                        bn_mean, bn_var, fc_w, fc_b)
    out = jax.block_until_ready(out)

    ref = reference(hidden_states, conv_w, conv_b, bn_gamma, bn_beta,
                    bn_mean, bn_var, fc_w, fc_b)
    np.testing.assert_allclose(np.asarray(out), np.asarray(ref),
                               atol=2e-4, rtol=2e-4)
    print("KERNEL_OK")
</pallas_src>

<mosaic_0001>
module attributes {stable_mosaic.version = 11 : i64} {
  func.func @_mozafari_head_kernel(%arg0: i32, %arg1: memref<2x8x128xf32, #tpu.memory_space<vmem>>, %arg2: memref<128x36xf32, #tpu.memory_space<vmem>>, %arg3: memref<1x1x12xf32, #tpu.memory_space<vmem>>, %arg4: memref<2x6x4xf32, #tpu.memory_space<vmem>>) attributes {dimension_semantics = [#tpu.dimension_semantics<parallel>], iteration_bounds = array<i64: 2>, scalar_prefetch = 0 : i64, scratch_operands = 0 : i64, tpu.core_type = #tpu.core_type<tc>, window_params = [{transform_indices = @transform_0, window_bounds = array<i64: 2, 8, 128>}, {pipeline_mode = #tpu.pipeline_mode<synchronous>, transform_indices = @transform_1, window_bounds = array<i64: 128, 36>}, {pipeline_mode = #tpu.pipeline_mode<synchronous>, transform_indices = @transform_2, window_bounds = array<i64: 1, 1, 12>}, {transform_indices = @transform_3, window_bounds = array<i64: 2, 6, 4>}]} {
    %c0 = arith.constant 0 : index
    %c0_0 = arith.constant 0 : index
    %c0_1 = arith.constant 0 : index
    %0 = vector.load %arg1[%c0, %c0_0, %c0_1] : memref<2x8x128xf32, #tpu.memory_space<vmem>>, vector<2x8x128xf32>
    %1 = vector.shape_cast %0 : vector<2x8x128xf32> to vector<16x128xf32>
    %c0_2 = arith.constant 0 : index
    %c0_3 = arith.constant 0 : index
    %2 = vector.load %arg2[%c0_2, %c0_3] : memref<128x36xf32, #tpu.memory_space<vmem>>, vector<128x36xf32>
    %cst = arith.constant dense<0.000000e+00> : vector<16x36xf32>
    %3 = tpu.matmul %1, %2, %cst {dimension_numbers = #tpu.dot_dimension_numbers<[1], [0], [0], [1], [0, 0, 1, 1], [], []>} : vector<16x128xf32>, vector<128x36xf32>, vector<16x36xf32> -> vector<16x36xf32>
    %4 = vector.shape_cast %3 : vector<16x36xf32> to vector<2x8x36xf32>
    %5 = vector.extract_strided_slice %4 {offsets = [0, 0, 0], sizes = [2, 8, 12], strides = [1, 1, 1]} : vector<2x8x36xf32> to vector<2x8x12xf32>
    %6 = vector.extract_strided_slice %4 {offsets = [0, 0, 12], sizes = [2, 8, 12], strides = [1, 1, 1]} : vector<2x8x36xf32> to vector<2x8x12xf32>
    %7 = vector.extract_strided_slice %4 {offsets = [0, 0, 24], sizes = [2, 8, 12], strides = [1, 1, 1]} : vector<2x8x36xf32> to vector<2x8x12xf32>
    %cst_4 = arith.constant 0.000000e+00 : f32
    %8 = vector.broadcast %cst_4 : f32 to vector<2x1x12xf32>
    %9 = vector.extract_strided_slice %5 {offsets = [0, 0, 0], sizes = [2, 7, 12], strides = [1, 1, 1]} : vector<2x8x12xf32> to vector<2x7x12xf32>
    %10 = tpu.concatenate %8, %9 in 1 : vector<2x1x12xf32>, vector<2x7x12xf32> -> vector<2x8x12xf32>
    %11 = arith.addf %10, %6 : vector<2x8x12xf32>
    %12 = vector.extract_strided_slice %7 {offsets = [0, 1, 0], sizes = [2, 7, 12], strides = [1, 1, 1]} : vector<2x8x12xf32> to vector<2x7x12xf32>
    %13 = tpu.concatenate %12, %8 in 1 : vector<2x7x12xf32>, vector<2x1x12xf32> -> vector<2x8x12xf32>
    %14 = arith.addf %11, %13 : vector<2x8x12xf32>
    %c0_5 = arith.constant 0 : index
    %c0_6 = arith.constant 0 : index
    %c0_7 = arith.constant 0 : index
    %15 = vector.load %arg3[%c0_5, %c0_6, %c0_7] : memref<1x1x12xf32, #tpu.memory_space<vmem>>, vector<1x1x12xf32>
    %16 = vector.broadcast %15 : vector<1x1x12xf32> to vector<2x8x12xf32>
    %17 = arith.addf %14, %16 : vector<2x8x12xf32>
    %cst_8 = arith.constant 0.000000e+00 : f32
    %18 = vector.broadcast %cst_8 : f32 to vector<2x8x12xf32>
    %19 = arith.maximumf %17, %18 : vector<2x8x12xf32>
    %20 = vector.extract_strided_slice %19 {offsets = [0, 0, 0], sizes = [2, 8, 4], strides = [1, 1, 1]} : vector<2x8x12xf32> to vector<2x8x4xf32>
    %21 = vector.extract_strided_slice %19 {offsets = [0, 0, 4], sizes = [2, 8, 4], strides = [1, 1, 1]} : vector<2x8x12xf32> to vector<2x8x4xf32>
    %22 = arith.maximumf %20, %21 : vector<2x8x4xf32>
    %23 = vector.extract_strided_slice %19 {offsets = [0, 0, 8], sizes = [2, 8, 4], strides = [1, 1, 1]} : vector<2x8x12xf32> to vector<2x8x4xf32>
    %24 = arith.maximumf %22, %23 : vector<2x8x4xf32>
    %25 = vector.extract_strided_slice %24 {offsets = [0, 0, 0], sizes = [2, 6, 4], strides = [1, 1, 1]} : vector<2x8x4xf32> to vector<2x6x4xf32>
    %26 = vector.extract_strided_slice %24 {offsets = [0, 1, 0], sizes = [2, 6, 4], strides = [1, 1, 1]} : vector<2x8x4xf32> to vector<2x6x4xf32>
    %27 = arith.maximumf %25, %26 : vector<2x6x4xf32>
    %28 = vector.extract_strided_slice %24 {offsets = [0, 2, 0], sizes = [2, 6, 4], strides = [1, 1, 1]} : vector<2x8x4xf32> to vector<2x6x4xf32>
    %29 = arith.maximumf %27, %28 : vector<2x6x4xf32>
    %c0_9 = arith.constant 0 : index
    %c0_10 = arith.constant 0 : index
    %c0_11 = arith.constant 0 : index
    %30 = vector.load %arg4[%c0_9, %c0_10, %c0_11] : memref<2x6x4xf32, #tpu.memory_space<vmem>>, vector<2x6x4xf32>
    tpu.vector_store %arg4[%c0_9, %c0_10, %c0_11], %29 {strides = array<i32>} : memref<2x6x4xf32, #tpu.memory_space<vmem>>, vector<2x6x4xf32>,
    return
  }
  func.func @transform_0(%arg0: i32) -> (i32, i32, i32) {
    %c0_i32 = arith.constant 0 : i32
    %c0_i32_0 = arith.constant 0 : i32
    %c0_i32_1 = arith.constant 0 : i32
    return %arg0, %c0_i32, %c0_i32_0 : i32, i32, i32
  }
  func.func @transform_1(%arg0: i32) -> (i32, i32) {
    %c0_i32 = arith.constant 0 : i32
    %c0_i32_0 = arith.constant 0 : i32
    %c0_i32_1 = arith.constant 0 : i32
    return %c0_i32, %c0_i32_0 : i32, i32
  }
  func.func @transform_2(%arg0: i32) -> (i32, i32, i32) {
    %c0_i32 = arith.constant 0 : i32
    %c0_i32_0 = arith.constant 0 : i32
    %c0_i32_1 = arith.constant 0 : i32
    %c0_i32_2 = arith.constant 0 : i32
    return %c0_i32, %c0_i32_0, %c0_i32_1 : i32, i32, i32
  }
  func.func @transform_3(%arg0: i32) -> (i32, i32, i32) {
    %c0_i32 = arith.constant 0 : i32
    %c0_i32_0 = arith.constant 0 : i32
    %c0_i32_1 = arith.constant 0 : i32
    return %arg0, %c0_i32, %c0_i32_0 : i32, i32, i32
  }
}

</mosaic_0001>

<bundles_post_ra>
// kernel: tpu_custom_call.1
= control target key start
LH: loop header
LB: loop body
LE: loop exit
PB: predicated region body
PF: predicated region fallthrough
CT: control target
= control target key end

     0   :  { %s512_s12 = smov 0   ;;  %s591_s0 = inlined_call_operand.vmem [shape: f32[4,8,128], index: 0, kind: input, shape index: {}]   ;;  %s592_s1 = inlined_call_operand.vmem [shape: f32[128,36], index: 1, kind: input, shape index: {}]   ;;  %s593_s2 = inlined_call_operand.vmem [shape: f32[1,1,12], index: 2, kind: input, shape index: {}]   ;;  %s594_s3 = inlined_call_operand.vmem [shape: f32[4,6,4], index: 3, kind: output, shape index: {}]  }
   0x1 LB: > { %s403_s13 = sadd.s32 4294967295, %s486_s12   ;;  %p407_p0 = scmp.ge.s32.totalorder %s486_s12, 1  ;;  %s486_s12 = sphi %s512_s12, %s13_s12  }
   0x2   : > { %p138_p1 = scmp.lt.s32.totalorder %s486_s12, 3 }
   0x4   : > { %p139_p2 = pnand %p407_p0, %p138_p1 }
   0x5   : > { %s408_s18 = sshll.u32 (!%p139_p2), %s403_s13, 1  ;;  %s488_s27 = smov (!%p139_p2), 116  }
   0x6   : > { %142 = sbr.rel (%p139_p2) target bundleno = 495 (0x1ef), region = 32  ;;  %p163_p3 = scmp.lt.s32.totalorder (!%p139_p2), %s408_s18, 3 }
   0x7   : > { %s489_s29 = smov (!%p139_p2), 104   ;;  %s490_s4 = smov (!%p139_p2), 124  }
   0x8   : > { %s491_s5 = smov (!%p139_p2), 120  }
   0xb   : > { %v191_v0 = vld [vmem:[%s592_s1 + $0x78] sm:$0xff]  ;;  %v190_v1 = vld [vmem:[%s592_s1 + $0x70] sm:$0xff]  ;;  %v189_v2 = vld [vmem:[%s592_s1 + $0x68] sm:$0xff]  ;;  %s596_s18 = smov (!%p163_p3, %s408_s18), 3  ;;  %vm288_vm0 = vcmask 1046528   ;;  %vm273_vm1 = vcmask 1040384  }
   0xc   : > { %433 = vmatprep.subr.mxu0 %v191_v0  ;;  %v188_v3 = vld [vmem:[%s592_s1 + $0x60] sm:$0xff]  ;;  %s409_s23 = sshll.u32 %s596_s18, 3  ;;  %v187_v4 = vld [vmem:[%s592_s1 + $0x58] sm:$0xff]  ;;  %v186_v6 = vld [vmem:[%s592_s1 + $0x50] sm:$0xff]  ;;  %vm344_vm2 = vcmask 29696  }
   0xd   : > { %434 = vmatpush3.msra.mxu0 %v191_v0  ;;  %s543_s28 = scalar_lea.vmem %s591_s0, %s409_s23  ;;  %v185_v7 = vld [vmem:[%s592_s1 + $0x48] sm:$0xff]  ;;  %v184_v8 = vld [vmem:[%s592_s1 + $0x40] sm:$0xff]  ;;  %v183_v9 = vld [vmem:[%s592_s1 + $0x38] sm:$0xff]  ;;  %s172_s8 = scalar_lea.vmem %s594_s3, %s409_s23 }
   0xe   : > { %435 = vmatprep.subr.mxu0 %v190_v1  ;;  %v174_v5 = vld [vmem:[%s543_s28] sm:$0xff]  ;;  %v182_v10 = vld [vmem:[%s592_s1 + $0x30] sm:$0xff]  ;;  %v181_v11 = vld [vmem:[%s592_s1 + $0x28] sm:$0xff] }
   0xf   : > { %436 = vmatpush3.msra.mxu0 %v190_v1  ;;  %465 = vmatprep.mubr.f32.mxu0 %v174_v5  ;;  %v180_v12 = vld [vmem:[%s592_s1 + $0x20] sm:$0xff]  ;;  %v179_v13 = vld [vmem:[%s592_s1 + $0x18] sm:$0xff]  ;;  %v178_v14 = vld [vmem:[%s592_s1 + $0x10] sm:$0xff] }
  0x10   : > { %437 = vmatprep.subr.mxu0 %v189_v2  ;;  %v177_v15 = vld [vmem:[%s592_s1 + $0x8] sm:$0xff]  ;;  %v176_v16 = vld [vmem:[%s592_s1] sm:$0xff] }
  0x11   : > { %438 = vmatpush3.msra.mxu0 %v189_v2  ;;  %v175_v17 = vld [vmem:[%s543_s28 + $0x8] sm:$0xff]  ;;  %v412_v29 = vld [vmem:[%s593_s2] ss:$0 sm:$0xff] }
  0x12   : > { %439 = vmatprep.subr.mxu0 %v188_v3 }
  0x13   : > { %440 = vmatpush3.msra.mxu0 %v188_v3 }
  0x14   : > { %441 = vmatprep.subr.mxu0 %v187_v4 }
  0x15   : > { %442 = vmatpush3.msra.mxu0 %v187_v4 }
  0x16   : > { %443 = vmatprep.subr.mxu0 %v186_v6 }
  0x17   : > { %444 = vmatpush3.msra.mxu0 %v186_v6 }
  0x18   : > { %445 = vmatprep.subr.mxu0 %v185_v7 }
  0x19   : > { %446 = vmatpush3.msra.mxu0 %v185_v7 }
  0x1a   : > { %447 = vmatprep.subr.mxu0 %v184_v8 }
  0x1b   : > { %448 = vmatpush3.msra.mxu0 %v184_v8 }
  0x1c   : > { %449 = vmatprep.subr.mxu0 %v183_v9 }
  0x1d   : > { %450 = vmatpush3.msra.mxu0 %v183_v9 }
  0x1e   : > { %451 = vmatprep.subr.mxu0 %v182_v10 }
  0x1f   : > { %452 = vmatpush3.msra.mxu0 %v182_v10 }
  0x20   : > { %453 = vmatprep.subr.mxu0 %v181_v11 }
  0x21   : > { %454 = vmatpush3.msra.mxu0 %v181_v11 }
  0x22   : > { %455 = vmatprep.subr.mxu0 %v180_v12 }
  0x23   : > { %456 = vmatpush3.msra.mxu0 %v180_v12 }
  0x24   : > { %457 = vmatprep.subr.mxu0 %v179_v13 }
  0x25   : > { %458 = vmatpush3.msra.mxu0 %v179_v13 }
  0x26   : > { %459 = vmatprep.subr.mxu0 %v178_v14 }
  0x27   : > { %460 = vmatpush3.msra.mxu0 %v178_v14 }
  0x28   : > { %461 = vmatprep.subr.mxu0 %v177_v15 }
  0x29   : > { %462 = vmatpush3.msra.mxu0 %v177_v15 }
  0x2a   : > { %463 = vmatprep.subr.mxu0 %v176_v16 }
  0x2b   : > { %464 = vmatpush3.msra.mxu0 %v176_v16 }
  0x2c   : > { %466 = vmatmul.mubr.f32.vlgmr.msra.gmra.mxu0 %v175_v17 }
  0xec   : > { %v467_v18 = vpop.f32.mrf.mxu0 }
  0xed   : > { %v285_v21 = vrot.slane %v467_v18, 1  ;;  %v270_v27 = vrot.slane %v467_v18, 7 }
  0xee   : > { %v258_v19 = vpop.f32.mrf.mxu0 }
  0xef   : > { %v284_v20 = vrot.slane %v258_v19, 1  ;;  %276 = vrot.lane.b32.xlu0 %v258_v19, %s488_s27  ;;  %v290_v23 = vsel %vm288_vm0, %v285_v21, 0.0  ;;  %v269_v24 = vrot.slane %v258_v19, 7  ;;  %v275_v32 = vsel %vm273_vm1, 0.0, %v270_v27 }
  0xf1   : > { %v289_v22 = vsel %vm288_vm0, %v284_v20, 0.0  ;;  %v274_v26 = vsel %vm273_vm1, 0.0, %v269_v24 }
  0xf2   : > { %293 = vrot.lane.b32.xlu1 %v289_v22, %s489_s29 }
  0xf3   : > { %278 = vrot.lane.b32.xlu0 %v467_v18, %s488_s27 }
  0xf6   : > { %295 = vrot.lane.b32.xlu1 %v290_v23, %s489_s29 }
 0x161   : > { %v277_v25 = vpop.permute.xlu0 %276 }
 0x162   : > { %v282_v28 = vadd.f32 %v277_v25, %v274_v26 }
 0x164   : > { %v294_v30 = vpop.permute.xlu1 %293 }
 0x165   : > { %v299_v31 = vadd.f32 %v294_v30, %v282_v28  ;;  %v279_v33 = vpop.permute.xlu0 %278 }
 0x166   : > { %v283_v34 = vadd.f32 %v279_v33, %v275_v32 }
 0x167   : > { %v308_v35 = vadd.f32 %v412_v29, %v299_v31 }
 0x168   : > { %v296_v36 = vpop.permute.xlu1 %295 }
 0x169   : > { %v310_v37 = vmax.f32 %v308_v35, 0.0  ;;  %v300_v38 = vadd.f32 %v296_v36, %v283_v34 }
 0x16b   : > { %v309_v39 = vadd.f32 %v412_v29, %v300_v38  ;;  %314 = vrot.lane.b32.xlu0 %v310_v37, %s490_s4 }
 0x16d   : > { %v311_v40 = vmax.f32 %v309_v39, 0.0 }
 0x16f   : > { %316 = vrot.lane.b32.xlu1 %v311_v40, %s490_s4  ;;  %322 = vrot.lane.b32.xlu0 %v310_v37, %s491_s5 }
 0x173   : > { %324 = vrot.lane.b32.xlu1 %v311_v40, %s491_s5 }
 0x1dd   : > { %v315_v41 = vpop.permute.xlu0 %314 }
 0x1de   : > { %v320_v42 = vmax.f32 %v310_v37, %v315_v41 }
 0x1e1   : > { %v317_v43 = vpop.permute.xlu1 %316  ;;  %v323_v44 = vpop.permute.xlu0 %322 }
 0x1e2   : > { %v328_v45 = vmax.f32 %v320_v42, %v323_v44  ;;  %v321_v46 = vmax.f32 %v311_v40, %v317_v43 }
 0x1e4   : > { %v332_v47 = vrot.slane %v328_v45, 1  ;;  %v338_v50 = vrot.slane %v328_v45, 2 }
 0x1e5   : > { %v325_v48 = vpop.permute.xlu1 %324 }
 0x1e6   : > { %v336_v49 = vmax.f32 %v328_v45, %v332_v47  ;;  %v329_v51 = vmax.f32 %v321_v46, %v325_v48 }
 0x1e8   : > { %v342_v52 = vmax.f32 %v336_v49, %v338_v50  ;;  %v333_v53 = vrot.slane %v329_v51, 1  ;;  %v339_v55 = vrot.slane %v329_v51, 2 }
 0x1ea   : > { %345 = vst.msk [vmem:[%s172_s8] sm:$0x3f] %vm344_vm2, %v342_v52  ;;  %v337_v54 = vmax.f32 %v329_v51, %v333_v53 }
 0x1ec   : > { %v343_v56 = vmax.f32 %v337_v54, %v339_v55 }
 0x1ee   : > { %346 = vst.msk [vmem:[%s172_s8 + $0x8] sm:$0x3f] %vm344_vm2, %v343_v56 }
 0x1ef PF: > { %s13_s12 = sadd.s32 1, %s486_s12  }
 0x1f0   : > { %p10_p4 = scmp.ge.s32.totalorder %s13_s12, 4  }
 0x1f2   :  { %12 = sbr.rel (!%p10_p4) target bundleno = 1 (0x1), region = 62 }

</bundles_post_ra>
